<compile_context>
chip_gen: v6e
topology: v6e:2x2x1
jax: 0.10.0
libtpu: 0.0.40
codegen_flags: <defaults>
</compile_context>

<pallas_src>
import functools

import jax
import jax.numpy as jnp
from jax import lax
from jax.experimental import pallas as pl
from jax.experimental.pallas import tpu as pltpu

EMBEDDING_DIM = 100   # matches `embedding_dim = 100` in the PyTorch module
VOCAB_SIZE = 16       # small synthetic vocab (vo.length)

_LANE = 128
_SUBLANE = 8
_NEG_INF = -1e30      # bias for padded vocab columns (exp() underflows to 0)


def _round_up(x, m):
    return ((x + m - 1) // m) * m


def _skipgram_kernel(ids_ref, emb_ref, w_ref, b_ref, out_ref, table_ref):
    """ids_ref:   VMEM [block_n, 1] int32 token ids (padded slots hold 0)
       emb_ref:   VMEM [Vp, Dp] f32 padded embedding table
       w_ref:     VMEM [Vp, Dp] f32 padded linear weight (PyTorch layout)
       b_ref:     VMEM [1, Vp]  f32 padded bias (-1e30 in padded columns)
       out_ref:   VMEM [block_n, Vp] f32 log-probabilities
       table_ref: VMEM scratch [Vp, Vp] f32 -- per-token-id log-softmax table,
                  computed once on the first grid step and reused afterwards."""

    @pl.when(pl.program_id(0) == 0)
    def _():
        # logits[id, j] = sum_d emb[id, d] * W[j, d] + b[j]
        # (no transpose op: the MXU contracts dim 1 of both operands natively).
        logits = lax.dot_general(
            emb_ref[...], w_ref[...],
            dimension_numbers=(((1,), (1,)), ((), ())),
            preferred_element_type=jnp.float32) + b_ref[...]
        # Numerically-stable log_softmax along the (padded) vocab axis.
        m = jnp.max(logits, axis=-1, keepdims=True)
        shifted = logits - m
        lse = jnp.log(jnp.sum(jnp.exp(shifted), axis=-1, keepdims=True))
        table_ref[...] = shifted - lse

    # Row gather as a single one-hot matmul (no serial dynamic-slice copies).
    ids = ids_ref[...]                                      # [block_n, 1] int32
    bn = ids.shape[0]
    vp = table_ref.shape[0]
    one_hot = (lax.broadcasted_iota(jnp.int32, (bn, vp), 1) == ids)
    out_ref[...] = jnp.dot(one_hot.astype(jnp.float32), table_ref[...],
                           preferred_element_type=jnp.float32
                           ).astype(out_ref.dtype)


def prepare_params(emb_table, linear_w, linear_b):
    """One-time padding of parameters to lane/sublane-aligned shapes.

    emb_table: [V, D]; linear_w: [V, D] (PyTorch layout); linear_b: [V].
    Returns (emb_pad [Vp, Dp], w_pad [Vp, Dp], b_pad [1, Vp])."""
    v, d = emb_table.shape
    vp = _round_up(v, _LANE)
    dp = _round_up(d, _LANE)
    emb_pad = jnp.zeros((vp, dp), jnp.float32).at[:v, :d].set(emb_table)
    w_pad = jnp.zeros((vp, dp), jnp.float32).at[:v, :d].set(linear_w)
    # Padded vocab columns get a huge negative bias so they contribute 0 to the
    # softmax normalizer; real columns then match the unpadded result exactly.
    b_pad = jnp.full((1, vp), _NEG_INF, jnp.float32).at[0, :v].set(linear_b)
    return emb_pad, w_pad, b_pad


@functools.partial(jax.jit, static_argnames=("vocab_size",))
def skipgram_forward(inputs, emb_pad, w_pad, b_pad, *, vocab_size):
    """inputs: int array of arbitrary shape, values in [0, vocab_size).
    emb_pad / w_pad / b_pad: padded parameters from prepare_params()."""
    orig_shape = inputs.shape
    ids = inputs.reshape(-1).astype(jnp.int32)
    n = ids.shape[0]
    vp, dp = emb_pad.shape

    # Tile the token axis; at toy sizes this is a single grid step.
    block_n = min(512, _round_up(n, _SUBLANE))
    n_pad = _round_up(n, block_n)
    # Padded token slots get id 0 (a valid row); their outputs are sliced away.
    ids2d = jnp.zeros((n_pad, 1), jnp.int32).at[:n, 0].set(ids)

    out = pl.pallas_call(
        _skipgram_kernel,
        out_shape=jax.ShapeDtypeStruct((n_pad, vp), jnp.float32),
        grid=(n_pad // block_n,),
        in_specs=[
            pl.BlockSpec((block_n, 1), lambda i: (i, 0)),   # token ids
            pl.BlockSpec((vp, dp), lambda i: (0, 0)),       # embedding (resident)
            pl.BlockSpec((vp, dp), lambda i: (0, 0)),       # linear W  (resident)
            pl.BlockSpec((1, vp), lambda i: (0, 0)),        # bias      (resident)
        ],
        out_specs=pl.BlockSpec((block_n, vp), lambda i: (i, 0)),
        scratch_shapes=[pltpu.VMEM((vp, vp), jnp.float32)],
        # "arbitrary": grid steps run sequentially so the log-softmax table
        # written on step 0 is visible to all later steps.
        compiler_params=pltpu.CompilerParams(
            dimension_semantics=("arbitrary",)),
    )(ids2d, emb_pad, w_pad, b_pad)

    return out[:n, :vocab_size].reshape(orig_shape + (vocab_size,))


def _reference_forward(inputs, emb_table, linear_w, linear_b):
    x = emb_table[inputs]                                   # embedding lookup
    logits = jnp.einsum("...d,vd->...v", x, linear_w) + linear_b
    return jax.nn.log_softmax(logits, axis=-1)


if __name__ == "__main__":
    key = jax.random.PRNGKey(0)
    k_ids, k_emb, k_w, k_b = jax.random.split(key, 4)

    # Deterministic parameter init (mimics nn.Embedding ~ N(0,1),
    # nn.Linear ~ U(-1/sqrt(D), 1/sqrt(D))).
    emb_table = jax.random.normal(k_emb, (VOCAB_SIZE, EMBEDDING_DIM), jnp.float32)
    bound = 1.0 / (EMBEDDING_DIM ** 0.5)
    linear_w = jax.random.uniform(k_w, (VOCAB_SIZE, EMBEDDING_DIM), jnp.float32,
                                  minval=-bound, maxval=bound)
    linear_b = jax.random.uniform(k_b, (VOCAB_SIZE,), jnp.float32,
                                  minval=-bound, maxval=bound)

    # Pad parameters ONCE at creation time (lane/sublane alignment).
    emb_pad, w_pad, b_pad = prepare_params(emb_table, linear_w, linear_b)

    # Small batch of token ids: batch=2, seq=8.
    inputs = jax.random.randint(k_ids, (2, 8), 0, VOCAB_SIZE, jnp.int32)

    out = skipgram_forward(inputs, emb_pad, w_pad, b_pad,
                           vocab_size=VOCAB_SIZE)
    out = jax.block_until_ready(out)

    ref = _reference_forward(inputs, emb_table, linear_w, linear_b)
    if not jnp.allclose(out, ref, atol=1e-4, rtol=1e-4):
        raise AssertionError("Pallas kernel mismatch vs reference")

    print("KERNEL_OK")
</pallas_src>

<mosaic_0001>
module attributes {stable_mosaic.version = 11 : i64} {
  func.func @_skipgram_kernel(%arg0: i32, %arg1: memref<16x1xi32, #tpu.memory_space<vmem>>, %arg2: memref<128x128xf32, #tpu.memory_space<vmem>>, %arg3: memref<128x128xf32, #tpu.memory_space<vmem>>, %arg4: memref<1x128xf32, #tpu.memory_space<vmem>>, %arg5: memref<16x128xf32, #tpu.memory_space<vmem>>, %arg6: memref<128x128xf32, #tpu.memory_space<vmem>>) attributes {dimension_semantics = [#tpu.dimension_semantics<arbitrary>], iteration_bounds = array<i64: 1>, scalar_prefetch = 0 : i64, scratch_operands = 1 : i64, tpu.core_type = #tpu.core_type<tc>, window_params = [{transform_indices = @transform_0, window_bounds = array<i64: 16, 1>}, {pipeline_mode = #tpu.pipeline_mode<synchronous>, transform_indices = @transform_1, window_bounds = array<i64: 128, 128>}, {pipeline_mode = #tpu.pipeline_mode<synchronous>, transform_indices = @transform_2, window_bounds = array<i64: 128, 128>}, {pipeline_mode = #tpu.pipeline_mode<synchronous>, transform_indices = @transform_3, window_bounds = array<i64: 1, 128>}, {transform_indices = @transform_4, window_bounds = array<i64: 16, 128>}]} {
    %c0_i32 = arith.constant 0 : i32
    %0 = arith.cmpi eq, %arg0, %c0_i32 : i32
    %1 = arith.extui %0 : i1 to i32
    %c0_i32_0 = arith.constant 0 : i32
    %2 = arith.cmpi ne, %1, %c0_i32_0 : i32
    scf.if %2 {
      %c0_6 = arith.constant 0 : index
      %c0_7 = arith.constant 0 : index
      %12 = vector.load %arg2[%c0_6, %c0_7] : memref<128x128xf32, #tpu.memory_space<vmem>>, vector<128x128xf32>
      %c0_8 = arith.constant 0 : index
      %c0_9 = arith.constant 0 : index
      %13 = vector.load %arg3[%c0_8, %c0_9] : memref<128x128xf32, #tpu.memory_space<vmem>>, vector<128x128xf32>
      %cst_10 = arith.constant dense<0.000000e+00> : vector<128x128xf32>
      %14 = tpu.matmul %12, %13, %cst_10 {dimension_numbers = #tpu.dot_dimension_numbers<[1], [1], [0], [0], [0, 0, 1, 0], [], []>} : vector<128x128xf32>, vector<128x128xf32>, vector<128x128xf32> -> vector<128x128xf32>
      %c0_11 = arith.constant 0 : index
      %c0_12 = arith.constant 0 : index
      %15 = vector.load %arg4[%c0_11, %c0_12] : memref<1x128xf32, #tpu.memory_space<vmem>>, vector<1x128xf32>
      %16 = vector.broadcast %15 : vector<1x128xf32> to vector<128x128xf32>
      %17 = arith.addf %14, %16 : vector<128x128xf32>
      %cst_13 = arith.constant dense<0xFF800000> : vector<128xf32>
      %18 = vector.multi_reduction <maximumf>, %17, %cst_13 [1] : vector<128x128xf32> to vector<128xf32>
      %19 = vector.shape_cast %18 : vector<128xf32> to vector<128x1xf32>
      %20 = vector.broadcast %19 : vector<128x1xf32> to vector<128x128xf32>
      %21 = arith.subf %17, %20 : vector<128x128xf32>
      %22 = math.exp %21 : vector<128x128xf32>
      %cst_14 = arith.constant dense<0.000000e+00> : vector<128xf32>
      %23 = vector.multi_reduction <add>, %22, %cst_14 [1] : vector<128x128xf32> to vector<128xf32>
      %24 = vector.shape_cast %23 : vector<128xf32> to vector<128x1xf32>
      %25 = math.log %24 : vector<128x1xf32>
      %26 = vector.broadcast %25 : vector<128x1xf32> to vector<128x128xf32>
      %27 = arith.subf %21, %26 : vector<128x128xf32>
      %c0_15 = arith.constant 0 : index
      %c0_16 = arith.constant 0 : index
      %28 = vector.load %arg6[%c0_15, %c0_16] : memref<128x128xf32, #tpu.memory_space<vmem>>, vector<128x128xf32>
      tpu.vector_store %arg6[%c0_15, %c0_16], %27 {strides = array<i32>} : memref<128x128xf32, #tpu.memory_space<vmem>>, vector<128x128xf32>,
    } else {
    }
    %c0 = arith.constant 0 : index
    %c0_1 = arith.constant 0 : index
    %3 = vector.load %arg1[%c0, %c0_1] : memref<16x1xi32, #tpu.memory_space<vmem>>, vector<16x1xi32>
    %4 = tpu.iota {dimensions = array<i32: 1>} : vector<16x128xi32>
    %5 = vector.broadcast %3 : vector<16x1xi32> to vector<16x128xi32>
    %6 = arith.cmpi eq, %4, %5 : vector<16x128xi32>
    %7 = arith.extui %6 : vector<16x128xi1> to vector<16x128xi32>
    %8 = arith.sitofp %7 : vector<16x128xi32> to vector<16x128xf32>
    %c0_2 = arith.constant 0 : index
    %c0_3 = arith.constant 0 : index
    %9 = vector.load %arg6[%c0_2, %c0_3] : memref<128x128xf32, #tpu.memory_space<vmem>>, vector<128x128xf32>
    %cst = arith.constant dense<0.000000e+00> : vector<16x128xf32>
    %10 = tpu.matmul %8, %9, %cst {dimension_numbers = #tpu.dot_dimension_numbers<[1], [0], [0], [1], [0, 0, 1, 1], [], []>} : vector<16x128xf32>, vector<128x128xf32>, vector<16x128xf32> -> vector<16x128xf32>
    %c0_4 = arith.constant 0 : index
    %c0_5 = arith.constant 0 : index
    %11 = vector.load %arg5[%c0_4, %c0_5] : memref<16x128xf32, #tpu.memory_space<vmem>>, vector<16x128xf32>
    tpu.vector_store %arg5[%c0_4, %c0_5], %10 {strides = array<i32>} : memref<16x128xf32, #tpu.memory_space<vmem>>, vector<16x128xf32>,
    return
  }
  func.func @transform_0(%arg0: i32) -> (i32, i32) {
    %c0_i32 = arith.constant 0 : i32
    %c0_i32_0 = arith.constant 0 : i32
    return %arg0, %c0_i32 : i32, i32
  }
  func.func @transform_1(%arg0: i32) -> (i32, i32) {
    %c0_i32 = arith.constant 0 : i32
    %c0_i32_0 = arith.constant 0 : i32
    %c0_i32_1 = arith.constant 0 : i32
    return %c0_i32, %c0_i32_0 : i32, i32
  }
  func.func @transform_2(%arg0: i32) -> (i32, i32) {
    %c0_i32 = arith.constant 0 : i32
    %c0_i32_0 = arith.constant 0 : i32
    %c0_i32_1 = arith.constant 0 : i32
    return %c0_i32, %c0_i32_0 : i32, i32
  }
  func.func @transform_3(%arg0: i32) -> (i32, i32) {
    %c0_i32 = arith.constant 0 : i32
    %c0_i32_0 = arith.constant 0 : i32
    %c0_i32_1 = arith.constant 0 : i32
    return %c0_i32, %c0_i32_0 : i32, i32
  }
  func.func @transform_4(%arg0: i32) -> (i32, i32) {
    %c0_i32 = arith.constant 0 : i32
    %c0_i32_0 = arith.constant 0 : i32
    return %arg0, %c0_i32 : i32, i32
  }
}

</mosaic_0001>

<bundles_post_ra>
// kernel: skipgram_forward.1
= control target key start
LH: loop header
LB: loop body
LE: loop exit
PB: predicated region body
PF: predicated region fallthrough
CT: control target
= control target key end

     0   :  { %9 = vsyncpa [#allocation4], 0  ;;  %s918_s0 = inlined_call_operand.vmem [shape: s32[16,1], index: 0, kind: input, shape index: {}]   ;;  %s919_s1 = inlined_call_operand.hbm [shape: f32[128,128], index: 1, kind: input, shape index: {}]   ;;  %s920_s2 = inlined_call_operand.hbm [shape: f32[128,128], index: 2, kind: input, shape index: {}]   ;;  %s921_s3 = inlined_call_operand.vmem [shape: f32[1,128], index: 3, kind: input, shape index: {}]   ;;  %s922_s4 = inlined_call_operand.vmem [shape: f32[16,128], index: 4, kind: output, shape index: {}]  }
   0x1   :  { %10 = vsyncpa [#allocation6], 0  ;;  %s786_s15 = smov [#allocation3]  }
   0x2   :  { %s18_s16 = sshll.u32 %s786_s15, 4  ;;  %s19_s16 = int_to_ptr.vmem [resolvable:$true] %s18_s16 }
   0x3   :  { %s750_s17 = scalar_lea.vmem %s19_s16, 2048  ;;  %p755_p1 = scmp.lt.s32.totalorder %s19_s16, %s19_s16 }
   0x4   :  { %p751_p0 = scmp.ne.s32.totalorder %s19_s16, %s750_s17  ;;  %p756_p2 = scmp.lt.s32.totalorder %s750_s17, %s750_s17 }
   0x6   :  { %p757_p3 = por %p756_p2, %p755_p1 }
   0x8   :  { %p758_p4 = pnand %p757_p3, %p751_p0 }
   0xa   :  { %761 = shalt.err (!%p758_p4)
}
   0xb   :  { %s787_s18 = smov 128   ;;  %s788_s19 = smov 8  }
   0xc   :  { %24 = dma.hbm_to_vmem [thread:$0]  %s919_s1, 2048, %s19_s16, [#allocation4], %s787_s18, %s787_s18, %s788_s19  }
   0xd   :  { %s789_s22 = smov [#allocation5]  }
   0xe   :  { %s30_s23 = sshll.u32 %s789_s22, 4  ;;  %s31_s23 = int_to_ptr.vmem [resolvable:$true] %s30_s23 }
   0xf   :  { %s770_s24 = scalar_lea.vmem %s31_s23, 2048  ;;  %p775_p6 = scmp.lt.s32.totalorder %s31_s23, %s31_s23 }
  0x10   :  { %p771_p5 = scmp.ne.s32.totalorder %s31_s23, %s770_s24  ;;  %p776_p7 = scmp.lt.s32.totalorder %s770_s24, %s770_s24 }
  0x12   :  { %p777_p8 = por %p776_p7, %p775_p6 }
  0x14   :  { %p778_p9 = pnand %p777_p8, %p771_p5 }
  0x16   :  { %781 = shalt.err (!%p778_p9)
}
  0x17   :  { %36 = dma.hbm_to_vmem [thread:$0]  %s920_s2, 2048, %s31_s23, [#allocation6], %s787_s18, %s787_s18, %s788_s19  }
  0x18   :  { %782 = dma.done.wait [#allocation4], 2048  }
  0x19   :  { %783 = vsyncadd [#allocation4], 4294965248 }
  0x1a   :  { %784 = dma.done.wait [#allocation6], 2048  }
  0x1b   :  { %785 = vsyncadd [#allocation6], 4294965248  ;;  %v80_v0 = vld [vmem:[#allocation5 + $0x78] sm:$0xff]  ;;  %v79_v1 = vld [vmem:[#allocation5 + $0x70] sm:$0xff] }
  0x1c   :  { %579 = vmatprep.subr.mxu0 %v80_v0  ;;  %v78_v2 = vld [vmem:[#allocation5 + $0x68] sm:$0xff]  ;;  %v49_v3 = vld [vmem:[#allocation3] sm:$0xff]  ;;  %v76_v5 = vld [vmem:[#allocation5 + $0x58] sm:$0xff] }
  0x1d   :  { %580 = vmatpush3.xpose.msra.mxu0 %v80_v0  ;;  %611 = vmatprep.mubr.f32.mxu0 %v49_v3  ;;  %v77_v4 = vld [vmem:[#allocation5 + $0x60] sm:$0xff]  ;;  %v75_v6 = vld [vmem:[#allocation5 + $0x50] sm:$0xff]  ;;  %v74_v7 = vld [vmem:[#allocation5 + $0x48] sm:$0xff] }
  0x1e   :  { %581 = vmatprep.subr.mxu0 %v79_v1  ;;  %v73_v8 = vld [vmem:[#allocation5 + $0x40] sm:$0xff]  ;;  %v72_v9 = vld [vmem:[#allocation5 + $0x38] sm:$0xff]  ;;  %v71_v10 = vld [vmem:[#allocation5 + $0x30] sm:$0xff] }
  0x1f   :  { %v70_v11 = vld [vmem:[#allocation5 + $0x28] sm:$0xff]  ;;  %v69_v12 = vld [vmem:[#allocation5 + $0x20] sm:$0xff]  ;;  %v68_v13 = vld [vmem:[#allocation5 + $0x18] sm:$0xff] }
  0x20   :  { %v67_v14 = vld [vmem:[#allocation5 + $0x10] sm:$0xff]  ;;  %v66_v15 = vld [vmem:[#allocation5 + $0x8] sm:$0xff]  ;;  %v65_v16 = vld [vmem:[#allocation5] sm:$0xff] }
  0x21   :  { %582 = vmatpush3.xpose.msra.mxu0 %v79_v1  ;;  %v50_v17 = vld [vmem:[#allocation3 + $0x8] sm:$0xff]  ;;  %v51_v18 = vld [vmem:[#allocation3 + $0x10] sm:$0xff]  ;;  %v52_v19 = vld [vmem:[#allocation3 + $0x18] sm:$0xff]  ;;  %v790_v1 = vmov 0  }
  0x22   :  { %583 = vmatprep.subr.mxu0 %v78_v2  ;;  %v53_v20 = vld [vmem:[#allocation3 + $0x20] sm:$0xff]  ;;  %v54_v21 = vld [vmem:[#allocation3 + $0x28] sm:$0xff]  ;;  %v55_v22 = vld [vmem:[#allocation3 + $0x30] sm:$0xff]  ;;  %676 = vset.pattern.permute.xlu0 %v790_v1 }
  0x23   :  { %v56_v23 = vld [vmem:[#allocation3 + $0x38] sm:$0xff]  ;;  %v57_v24 = vld [vmem:[#allocation3 + $0x40] sm:$0xff]  ;;  %v58_v25 = vld [vmem:[#allocation3 + $0x48] sm:$0xff]  ;;  %677 = vset.pattern.permute.xlu1 %v790_v1 }
  0x24   :  { %v59_v26 = vld [vmem:[#allocation3 + $0x50] sm:$0xff]  ;;  %v60_v27 = vld [vmem:[#allocation3 + $0x58] sm:$0xff]  ;;  %v61_v28 = vld [vmem:[#allocation3 + $0x60] sm:$0xff] }
  0x25   :  { %584 = vmatpush3.xpose.msra.mxu0 %v78_v2  ;;  %v62_v29 = vld [vmem:[#allocation3 + $0x68] sm:$0xff]  ;;  %v63_v30 = vld [vmem:[#allocation3 + $0x70] sm:$0xff]  ;;  %v64_v31 = vld [vmem:[#allocation3 + $0x78] sm:$0xff] }
  0x26   :  { %585 = vmatprep.subr.mxu0 %v77_v4  ;;  %v524_v44 = vld [vmem:[%s921_s3] ss:$0 sm:$0xff] }
  0x29   :  { %586 = vmatpush3.xpose.msra.mxu0 %v77_v4 }
  0x2a   :  { %587 = vmatprep.subr.mxu0 %v76_v5 }
  0x2d   :  { %588 = vmatpush3.xpose.msra.mxu0 %v76_v5 }
  0x2e   :  { %589 = vmatprep.subr.mxu0 %v75_v6 }
  0x31   :  { %590 = vmatpush3.xpose.msra.mxu0 %v75_v6 }
  0x32   :  { %591 = vmatprep.subr.mxu0 %v74_v7 }
  0x35   :  { %592 = vmatpush3.xpose.msra.mxu0 %v74_v7 }
  0x36   :  { %593 = vmatprep.subr.mxu0 %v73_v8 }
  0x39   :  { %594 = vmatpush3.xpose.msra.mxu0 %v73_v8 }
  0x3a   :  { %595 = vmatprep.subr.mxu0 %v72_v9 }
  0x3d   :  { %596 = vmatpush3.xpose.msra.mxu0 %v72_v9 }
  0x3e   :  { %597 = vmatprep.subr.mxu0 %v71_v10 }
  0x41   :  { %598 = vmatpush3.xpose.msra.mxu0 %v71_v10 }
  0x42   :  { %599 = vmatprep.subr.mxu0 %v70_v11 }
  0x45   :  { %600 = vmatpush3.xpose.msra.mxu0 %v70_v11 }
  0x46   :  { %601 = vmatprep.subr.mxu0 %v69_v12 }
  0x49   :  { %602 = vmatpush3.xpose.msra.mxu0 %v69_v12 }
  0x4a   :  { %603 = vmatprep.subr.mxu0 %v68_v13 }
  0x4d   :  { %604 = vmatpush3.xpose.msra.mxu0 %v68_v13 }
  0x4e   :  { %605 = vmatprep.subr.mxu0 %v67_v14 }
  0x51   :  { %606 = vmatpush3.xpose.msra.mxu0 %v67_v14 }
  0x52   :  { %607 = vmatprep.subr.mxu0 %v66_v15 }
  0x55   :  { %608 = vmatpush3.xpose.msra.mxu0 %v66_v15 }
  0x56   :  { %609 = vmatprep.subr.mxu0 %v65_v16 }
  0x59   :  { %610 = vmatpush3.xpose.msra.mxu0 %v65_v16 }
  0x5c   :  { %612 = vmatmul.mubr.f32.vlgmr.msra.gmra.mxu0 %v50_v17 }
  0x5d   :  { %614 = vmatprep.mubr.f32.mxu0 %v51_v18 }
  0x60   :  { %615 = vmatmul.mubr.f32.gmra.mxu0 %v52_v19 }
  0x61   :  { %617 = vmatprep.mubr.f32.mxu0 %v53_v20 }
  0x64   :  { %618 = vmatmul.mubr.f32.gmra.mxu0 %v54_v21 }
  0x65   :  { %620 = vmatprep.mubr.f32.mxu0 %v55_v22 }
  0x68   :  { %621 = vmatmul.mubr.f32.gmra.mxu0 %v56_v23 }
  0x69   :  { %623 = vmatprep.mubr.f32.mxu0 %v57_v24 }
  0x6c   :  { %624 = vmatmul.mubr.f32.gmra.mxu0 %v58_v25 }
  0x6d   :  { %626 = vmatprep.mubr.f32.mxu0 %v59_v26 }
  0x70   :  { %627 = vmatmul.mubr.f32.gmra.mxu0 %v60_v27 }
  0x71   :  { %629 = vmatprep.mubr.f32.mxu0 %v61_v28 }
  0x74   :  { %630 = vmatmul.mubr.f32.gmra.mxu0 %v62_v29 }
  0x75   :  { %632 = vmatprep.mubr.f32.mxu0 %v63_v30 }
  0x78   :  { %633 = vmatmul.mubr.f32.gmra.mxu0 %v64_v31 }
 0x11c   :  { %v613_v32 = vpop.f32.mrf.mxu0 }
 0x11d   :  { %v835_v0 = vadd.f32 %v613_v32, %v524_v44 }
 0x11e   :  { %v154_v33 = vpop.f32.mrf.mxu0 }
 0x11f   :  { %v829_v62 = vadd.f32 %v524_v44, %v154_v33 }
 0x120   :  { %v616_v34 = vpop.f32.mrf.mxu0 }
 0x121   :  { %v831_v63 = vadd.f32 %v616_v34, %v524_v44 }
 0x122   :  { %v164_v35 = vpop.f32.mrf.mxu0 }
 0x123   :  { %v826_v60 = vadd.f32 %v524_v44, %v164_v35 }
 0x124   :  { %v619_v36 = vpop.f32.mrf.mxu0 }
 0x125   :  { %v180_v61 = vadd.f32 %v619_v36, %v524_v44 }
 0x126   :  { %v174_v37 = vpop.f32.mrf.mxu0 }
 0x127   :  { %v175_v58 = vadd.f32 %v524_v44, %v174_v37 }
 0x128   :  { %v622_v38 = vpop.f32.mrf.mxu0 }
 0x129   :  { %v190_v59 = vadd.f32 %v622_v38, %v524_v44 }
 0x12a   :  { %v184_v39 = vpop.f32.mrf.mxu0 }
 0x12b   :  { %v185_v56 = vadd.f32 %v524_v44, %v184_v39 }
 0x12c   :  { %v625_v40 = vpop.f32.mrf.mxu0 }
 0x12d   :  { %v200_v57 = vadd.f32 %v625_v40, %v524_v44 }
 0x12e   :  { %v194_v41 = vpop.f32.mrf.mxu0 }
 0x12f   :  { %v195_v54 = vadd.f32 %v524_v44, %v194_v41 }
 0x130   :  { %v628_v42 = vpop.f32.mrf.mxu0 }
 0x131   :  { %v210_v55 = vadd.f32 %v628_v42, %v524_v44 }
 0x132   :  { %v204_v43 = vpop.f32.mrf.mxu0 }
 0x133   :  { %v205_v53 = vadd.f32 %v524_v44, %v204_v43 }
 0x134   :  { %v631_v45 = vpop.f32.mrf.mxu0 }
 0x135   :  { %v220_v46 = vadd.f32 %v631_v45, %v524_v44 }
 0x136   :  { %v214_v47 = vpop.f32.mrf.mxu0 }
 0x137   :  { %259 = vmax.xlane.f32.xlu1 %v220_v46  ;;  %v215_v49 = vadd.f32 %v524_v44, %v214_v47 }
 0x138   :  { %v634_v48 = vpop.f32.mrf.mxu0 }
 0x139   :  { %v230_v50 = vadd.f32 %v634_v48, %v524_v44 }
 0x13a   :  { %v224_v51 = vpop.f32.mrf.mxu0 }
 0x13b   :  { %263 = vmax.xlane.f32.xlu0 %v230_v50  ;;  %257 = vmax.xlane.f32.xlu1 %v215_v49  ;;  %v225_v52 = vadd.f32 %v524_v44, %v224_v51 }
 0x13f   :  { %261 = vmax.xlane.f32.xlu0 %v225_v52  ;;  %253 = vmax.xlane.f32.xlu1 %v205_v53 }
 0x143   :  { %255 = vmax.xlane.f32.xlu0 %v210_v55  ;;  %249 = vmax.xlane.f32.xlu1 %v195_v54 }
 0x147   :  { %251 = vmax.xlane.f32.xlu0 %v200_v57  ;;  %245 = vmax.xlane.f32.xlu1 %v185_v56 }
 0x14b   :  { %247 = vmax.xlane.f32.xlu0 %v190_v59  ;;  %241 = vmax.xlane.f32.xlu1 %v175_v58 }
 0x14f   :  { %243 = vmax.xlane.f32.xlu0 %v180_v61  ;;  %237 = vmax.xlane.f32.xlu1 %v826_v60 }
 0x153   :  { %239 = vmax.xlane.f32.xlu0 %v831_v63  ;;  %233 = vmax.xlane.f32.xlu1 %v829_v62 }
 0x157   :  { %235 = vmax.xlane.f32.xlu0 %v835_v0 }
 0x1c0   :  { %v260_v2 = vpop.xlane.xlu1 %259 }
 0x1c1   :  { %v838_v3 = vsub.f32 %v220_v46, %v260_v2  ;;  %v410_v2 = vld [vmem:[%s918_s0 + $0x8] sm:$0xff] }
 0x1c3   :  { %v307_v4 = vmul.f32 1.442695, %v838_v3 }
 0x1c4   :  { %v264_v5 = vpop.xlane.xlu0 %263  ;;  %v258_v6 = vpop.xlane.xlu1 %257 }
 0x1c5   :  { %678 = vpow2.f32 %v307_v4  ;;  %v841_v7 = vsub.f32 %v230_v50, %v264_v5  ;;  %v843_v8 = vsub.f32 %v215_v49, %v258_v6  ;;  %v409_v4 = vld [vmem:[%s918_s0] sm:$0xff] }
 0x1c7   :  { %v311_v9 = vmul.f32 1.442695, %v841_v7  ;;  %v305_v10 = vmul.f32 1.442695, %v843_v8 }
 0x1c8   :  { %v262_v11 = vpop.xlane.xlu0 %261  ;;  %v254_v12 = vpop.xlane.xlu1 %253 }
 0x1c9   :  { %680 = vpow2.f32 %v311_v9  ;;  %v847_v13 = vsub.f32 %v205_v53, %v254_v12  ;;  %v849_v14 = vsub.f32 %v225_v52, %v262_v11 }
 0x1ca   :  { %682 = vpow2.f32 %v305_v10 }
 0x1cb   :  { %v301_v15 = vmul.f32 1.442695, %v847_v13  ;;  %v309_v19 = vmul.f32 1.442695, %v849_v14 }
 0x1cc   :  { %v256_v16 = vpop.xlane.xlu0 %255  ;;  %v250_v17 = vpop.xlane.xlu1 %249 }
 0x1cd   :  { %v852_v18 = vsub.f32 %v210_v55, %v256_v16  ;;  %684 = vpow2.f32 %v301_v15  ;;  %v855_v20 = vsub.f32 %v195_v54, %v250_v17 }
 0x1cf   :  { %v303_v21 = vmul.f32 1.442695, %v852_v18  ;;  %v297_v26 = vmul.f32 1.442695, %v855_v20 }
 0x1d0   :  { %v252_v22 = vpop.xlane.xlu0 %251  ;;  %v246_v23 = vpop.xlane.xlu1 %245 }
 0x1d1   :  { %686 = vpow2.f32 %v303_v21  ;;  %v858_v24 = vsub.f32 %v200_v57, %v252_v22  ;;  %v861_v27 = vsub.f32 %v185_v56, %v246_v23 }
 0x1d2   :  { %v679_v25 = vpop.eup %678  ;;  %688 = vpow2.f32 %v309_v19 }
 0x1d3   :  { %v299_v28 = vmul.f32 1.442695, %v858_v24  ;;  %339 = vadd.xlane.f32.xlu0 %v679_v25  ;;  %v293_v33 = vmul.f32 1.442695, %v861_v27 }
 0x1d4   :  { %v248_v29 = vpop.xlane.xlu0 %247  ;;  %v242_v30 = vpop.xlane.xlu1 %241 }
 0x1d5   :  { %690 = vpow2.f32 %v299_v28  ;;  %v864_v31 = vsub.f32 %v190_v59, %v248_v29  ;;  %v867_v34 = vsub.f32 %v175_v58, %v242_v30 }
 0x1d6   :  { %v681_v32 = vpop.eup %680  ;;  %692 = vpow2.f32 %v297_v26 }
 0x1d7   :  { %v683_v35 = vpop.eup %682  ;;  %v295_v36 = vmul.f32 1.442695, %v864_v31  ;;  %343 = vadd.xlane.f32.xlu0 %v681_v32  ;;  %v289_v40 = vmul.f32 1.442695, %v867_v34 }
 0x1d8   :  { %337 = vadd.xlane.f32.xlu1 %v683_v35  ;;  %v244_v37 = vpop.xlane.xlu0 %243  ;;  %v238_v38 = vpop.xlane.xlu1 %237 }
 0x1d9   :  { %694 = vpow2.f32 %v295_v36  ;;  %v870_v39 = vsub.f32 %v180_v61, %v244_v37  ;;  %v874_v41 = vsub.f32 %v826_v60, %v238_v38 }
 0x1da   :  { %696 = vpow2.f32 %v293_v33  ;;  %v685_v42 = vpop.eup %684 }
 0x1db   :  { %v291_v43 = vmul.f32 1.442695, %v870_v39  ;;  %v285_v48 = vmul.f32 1.442695, %v874_v41 }
 0x1dc   :  { %333 = vadd.xlane.f32.xlu1 %v685_v42  ;;  %v240_v44 = vpop.xlane.xlu0 %239  ;;  %v234_v45 = vpop.xlane.xlu1 %233 }
 0x1dd   :  { %698 = vpow2.f32 %v291_v43  ;;  %v878_v46 = vsub.f32 %v831_v63, %v240_v44  ;;  %v882_v49 = vsub.f32 %v829_v62, %v234_v45 }
 0x1de   :  { %v687_v47 = vpop.eup %686  ;;  %700 = vpow2.f32 %v289_v40 }
 0x1df   :  { %v689_v50 = vpop.eup %688  ;;  %v287_v51 = vmul.f32 1.442695, %v878_v46  ;;  %335 = vadd.xlane.f32.xlu0 %v687_v47  ;;  %v281_v55 = vmul.f32 1.442695, %v882_v49  ;;  %v411_v47 = vlaneseq }
 0x1e0   :  { %341 = vadd.xlane.f32.xlu1 %v689_v50  ;;  %v236_v52 = vpop.xlane.xlu0 %235 }
 0x1e1   :  { %702 = vpow2.f32 %v287_v51  ;;  %v886_v53 = vsub.f32 %v835_v0, %v236_v52 }
 0x1e2   :  { %v691_v54 = vpop.eup %690  ;;  %704 = vpow2.f32 %v285_v48 }
 0x1e3   :  { %v693_v56 = vpop.eup %692  ;;  %v283_v57 = vmul.f32 1.442695, %v886_v53  ;;  %331 = vadd.xlane.f32.xlu0 %v691_v54 }
 0x1e4   :  { %329 = vadd.xlane.f32.xlu1 %v693_v56 }
 0x1e5   :  { %706 = vpow2.f32 %v283_v57 }
 0x1e6   :  { %v695_v58 = vpop.eup %694  ;;  %708 = vpow2.f32 %v281_v55 }
 0x1e7   :  { %v697_v59 = vpop.eup %696  ;;  %327 = vadd.xlane.f32.xlu0 %v695_v58 }
 0x1e8   :  { %325 = vadd.xlane.f32.xlu1 %v697_v59 }
 0x1ea   :  { %v699_v60 = vpop.eup %698 }
 0x1eb   :  { %v701_v61 = vpop.eup %700  ;;  %323 = vadd.xlane.f32.xlu0 %v699_v60 }
 0x1ec   :  { %321 = vadd.xlane.f32.xlu1 %v701_v61 }
 0x1ee   :  { %v703_v62 = vpop.eup %702 }
 0x1ef   :  { %v705_v63 = vpop.eup %704  ;;  %319 = vadd.xlane.f32.xlu0 %v703_v62 }
 0x1f0   :  { %317 = vadd.xlane.f32.xlu1 %v705_v63  ;;  %v791_v63 = vmov 1.0  }
 0x1f2   :  { %v707_v0 = vpop.eup %706 }
 0x1f3   :  { %v709_v1 = vpop.eup %708  ;;  %315 = vadd.xlane.f32.xlu0 %v707_v0 }
 0x1f4   :  { %313 = vadd.xlane.f32.xlu1 %v709_v1 }
 0x205   :  { %417 = vperm.xlu1 %677, %v410_v2  }
 0x209   :  { %414 = vperm.xlu0 %676, %v409_v4  }
 0x25c   :  { %v340_v5 = vpop.xlane.xlu0 %339 }
 0x260   :  { %v344_v6 = vpop.xlane.xlu0 %343 }
 0x261   :  { %710 = vlog2.f32 %v344_v6  ;;  %v338_v9 = vpop.xlane.xlu1 %337 }
 0x262   :  { %712 = vlog2.f32 %v340_v5 }
 0x263   :  { %714 = vlog2.f32 %v338_v9 }
 0x265   :  { %v334_v10 = vpop.xlane.xlu1 %333 }
 0x268   :  { %v336_v11 = vpop.xlane.xlu0 %335 }
 0x269   :  { %v342_v12 = vpop.xlane.xlu1 %341 }
 0x26a   :  { %716 = vlog2.f32 %v342_v12 }
 0x26b   :  { %718 = vlog2.f32 %v336_v11 }
 0x26c   :  { %v332_v15 = vpop.xlane.xlu0 %331  ;;  %720 = vlog2.f32 %v334_v10 }
 0x26d   :  { %v330_v16 = vpop.xlane.xlu1 %329  ;;  %722 = vlog2.f32 %v332_v15 }
 0x26e   :  { %v711_v17 = vpop.eup %710  ;;  %724 = vlog2.f32 %v330_v16 }
 0x26f   :  { %v376_v19 = vmul.f32 0.6931472, %v711_v17  ;;  %v713_v26 = vpop.eup %712 }
 0x270   :  { %v328_v21 = vpop.xlane.xlu0 %327  ;;  %v715_v29 = vpop.eup %714  ;;  %v372_v32 = vmul.f32 0.6931472, %v713_v26 }
 0x271   :  { %v326_v22 = vpop.xlane.xlu1 %325  ;;  %v392_v23 = vsub.f32 %v841_v7, %v376_v19  ;;  %726 = vlog2.f32 %v328_v21  ;;  %v370_v38 = vmul.f32 0.6931472, %v715_v29 }
 0x272   :  { %728 = vlog2.f32 %v326_v22  ;;  %v390_v43 = vsub.f32 %v838_v3, %v372_v32  ;;  %v412_v3 = vand.u32 127, %v411_v47 }
 0x273   :  { %635 = vmatprep.subr.mxu1 %v392_v23  ;;  %v389_v50 = vsub.f32 %v843_v8, %v370_v38 }
 0x274   :  { %636 = vmatpush3.msra.mxu1 %v392_v23  ;;  %v324_v25 = vpop.xlane.xlu0 %323 }
 0x275   :  { %v322_v28 = vpop.xlane.xlu1 %321  ;;  %730 = vlog2.f32 %v324_v25 }
 0x276   :  { %732 = vlog2.f32 %v322_v28 }
 0x277   :  { %v717_v30 = vpop.eup %716 }
 0x278   :  { %v374_v33 = vmul.f32 0.6931472, %v717_v30  ;;  %v320_v35 = vpop.xlane.xlu0 %319  ;;  %v719_v36 = vpop.eup %718 }
 0x279   :  { %v318_v37 = vpop.xlane.xlu1 %317  ;;  %v721_v40 = vpop.eup %720  ;;  %v368_v42 = vmul.f32 0.6931472, %v719_v36  ;;  %734 = vlog2.f32 %v320_v35 }
 0x27a   :  { %v391_v7 = vsub.f32 %v849_v14, %v374_v33  ;;  %v723_v44 = vpop.eup %722  ;;  %v366_v48 = vmul.f32 0.6931472, %v721_v40  ;;  %736 = vlog2.f32 %v318_v37 }
 0x27b   :  { %v725_v51 = vpop.eup %724  ;;  %v364_v54 = vmul.f32 0.6931472, %v723_v44  ;;  %v388_v14 = vsub.f32 %v852_v18, %v368_v42 }
 0x27c   :  { %637 = vmatprep.subr.mxu1 %v391_v7  ;;  %v316_v45 = vpop.xlane.xlu0 %315  ;;  %v362_v56 = vmul.f32 0.6931472, %v725_v51  ;;  %v387_v57 = vsub.f32 %v847_v13, %v366_v48 }
 0x27d   :  { %638 = vmatpush3.msra.mxu1 %v391_v7  ;;  %v314_v52 = vpop.xlane.xlu1 %313  ;;  %738 = vlog2.f32 %v316_v45  ;;  %v386_v8 = vsub.f32 %v858_v24, %v364_v54 }
 0x27e   :  { %639 = vmatprep.subr.mxu1 %v390_v43  ;;  %v727_v55 = vpop.eup %726  ;;  %740 = vlog2.f32 %v314_v52  ;;  %v385_v18 = vsub.f32 %v855_v20, %v362_v56 }
 0x27f   :  { %640 = vmatpush3.msra.mxu1 %v390_v43  ;;  %v729_v58 = vpop.eup %728  ;;  %v360_v59 = vmul.f32 0.6931472, %v727_v55 }
 0x280   :  { %641 = vmatprep.subr.mxu1 %v389_v50  ;;  %v358_v62 = vmul.f32 0.6931472, %v729_v58 }
 0x281   :  { %642 = vmatpush3.msra.mxu1 %v389_v50  ;;  %v384_v13 = vsub.f32 %v864_v31, %v360_v59  ;;  %v418_v17 = vpop.permute.xlu1 %417 }
 0x282   :  { %643 = vmatprep.subr.mxu1 %v388_v14  ;;  %v731_v61 = vpop.eup %730  ;;  %v383_v24 = vsub.f32 %v861_v27, %v358_v62  ;;  %vm420_vm1 = vcmp.eq.s32.totalorder %v412_v3, %v418_v17 }
 0x283   :  { %644 = vmatpush3.msra.mxu1 %v388_v14  ;;  %v733_v0 = vpop.eup %732  ;;  %v356_v1 = vmul.f32 0.6931472, %v731_v61 }
 0x284   :  { %645 = vmatprep.subr.mxu1 %v387_v57  ;;  %v415_v60 = vpop.permute.xlu0 %414  ;;  %v354_v4 = vmul.f32 0.6931472, %v733_v0 }
 0x285   :  { %646 = vmatpush3.msra.mxu1 %v387_v57  ;;  %vm419_vm0 = vcmp.eq.s32.totalorder %v412_v3, %v415_v60  ;;  %v382_v20 = vsub.f32 %v870_v39, %v356_v1 }
 0x286   :  { %647 = vmatprep.subr.mxu1 %v386_v8  ;;  %667 = vmatprep.mubr.msk.f32.mxu1 %vm419_vm0, %v791_v63  ;;  %v735_v2 = vpop.eup %734  ;;  %v381_v11 = vsub.f32 %v867_v34, %v354_v4 }
 0x287   :  { %648 = vmatpush3.msra.mxu1 %v386_v8  ;;  %v737_v5 = vpop.eup %736  ;;  %v352_v6 = vmul.f32 0.6931472, %v735_v2 }
 0x288   :  { %649 = vmatprep.subr.mxu1 %v385_v18  ;;  %v350_v10 = vmul.f32 0.6931472, %v737_v5 }
 0x289   :  { %650 = vmatpush3.msra.mxu1 %v385_v18  ;;  %v380_v15 = vsub.f32 %v878_v46, %v352_v6 }
 0x28a   :  { %651 = vmatprep.subr.mxu1 %v384_v13  ;;  %v739_v9 = vpop.eup %738  ;;  %v379_v16 = vsub.f32 %v874_v41, %v350_v10 }
 0x28b   :  { %652 = vmatpush3.msra.mxu1 %v384_v13  ;;  %v741_v12 = vpop.eup %740  ;;  %v348_v31 = vmul.f32 0.6931472, %v739_v9 }
 0x28c   :  { %653 = vmatprep.subr.mxu1 %v383_v24  ;;  %v346_v27 = vmul.f32 0.6931472, %v741_v12 }
 0x28d   :  { %654 = vmatpush3.msra.mxu1 %v383_v24  ;;  %v378_v39 = vsub.f32 %v886_v53, %v348_v31 }
 0x28e   :  { %655 = vmatprep.subr.mxu1 %v382_v20  ;;  %v377_v34 = vsub.f32 %v882_v49, %v346_v27 }
 0x28f   :  { %656 = vmatpush3.msra.mxu1 %v382_v20 }
 0x290   :  { %657 = vmatprep.subr.mxu1 %v381_v11 }
 0x291   :  { %658 = vmatpush3.msra.mxu1 %v381_v11 }
 0x292   :  { %659 = vmatprep.subr.mxu1 %v380_v15 }
 0x293   :  { %660 = vmatpush3.msra.mxu1 %v380_v15 }
 0x294   :  { %661 = vmatprep.subr.mxu1 %v379_v16 }
 0x295   :  { %662 = vmatpush3.msra.mxu1 %v379_v16 }
 0x296   :  { %663 = vmatprep.subr.mxu1 %v378_v39 }
 0x297   :  { %664 = vmatpush3.msra.mxu1 %v378_v39 }
 0x298   :  { %665 = vmatprep.subr.mxu1 %v377_v34 }
 0x299   :  { %666 = vmatpush3.msra.mxu1 %v377_v34 }
 0x29a   :  { %668 = vmatmul.mubr.msk.f32.vlgmr.msra.gmra.mxu1 %vm420_vm1, %v791_v63 }
 0x35a   :  { %v669_v46 = vpop.f32.mrf.mxu1 }
 0x35b   :  { %517 = vst [vmem:[%s922_s4 + $0x8] sm:$0xff] %v669_v46 }
 0x35c   :  { %v507_v41 = vpop.f32.mrf.mxu1 }
 0x35d   :  { %516 = vst [vmem:[%s922_s4] sm:$0xff] %v507_v41 }
 0x35e   :  { %522 = vsyncpa [#allocation4], 1 }
 0x35f   :  { %523 = vsyncpa [#allocation6], 1 }

</bundles_post_ra>
